<compile_context>
chip_gen: v7x
topology: tpu7x:2x2x1
jax: 0.10.0
libtpu: 0.0.40
codegen_flags: <defaults>
</compile_context>

<pallas_src>
import jax
import jax.numpy as jnp
from jax.experimental import pallas as pl
from jax.experimental.pallas import tpu as pltpu


# ----------------------------- kernels ------------------------------------ #

def _softmax_sublane_kernel(x_ref, o_ref):
    """Block (C, lane_tile): softmax over the channel (sublane, axis 0) dim."""
    x = x_ref[...].astype(jnp.float32)
    x = x - jnp.max(x, axis=0, keepdims=True)     # torch.max(x, dim=1)[0]
    ex = jnp.exp(x)
    o_ref[...] = (ex / jnp.sum(ex, axis=0, keepdims=True)).astype(o_ref.dtype)


def _softmax_lastdim_kernel(x_ref, o_ref):
    """Block (row_tile, C): softmax over the channel (lane, last) dim."""
    x = x_ref[...].astype(jnp.float32)
    x = x - jnp.max(x, axis=-1, keepdims=True)
    ex = jnp.exp(x)
    o_ref[...] = (ex / jnp.sum(ex, axis=-1, keepdims=True)).astype(o_ref.dtype)


# ----------------------------- wrapper ------------------------------------ #

_VMEM_LIMIT_BYTES = 44 << 20   # explicit scoped-VMEM cap: safe on v7x's 64 MiB
_TILE_F32_BYTES = 4 << 20      # ~4 MiB of f32 input per grid step
_SUBLANE_C_MAX = 8192          # sublane path as long as (C, 128) lanes fit a tile


def _choose_lane_tile(c, lanes):
    """Lane tile (multiple of 128) for the (C, lanes) layout."""
    lt = _TILE_F32_BYTES // (c * 4)
    lt = min(lt, lanes)
    return max(128, (lt // 128) * 128)


def _choose_row_tile(c, rows):
    """Row tile (multiple of 8) for the (rows, C) layout."""
    rt = _TILE_F32_BYTES // (c * 4)
    rt = min(rt, rows)
    return max(8, (rt // 8) * 8)


def safe_softmax(x):
    """x: NCHW float array (batch == 1). Softmax over channel dim (dim=1)."""
    n, c, h, w = x.shape
    # TODO(synk): for n > 1 the module's keepdim-less broadcast is invalid in
    # PyTorch (RuntimeError) unless n == c; only the sane n == 1 case is
    # supported here.
    assert n == 1, "SafeSoftMax broadcast (no keepdim) requires batch == 1"
    hw = h * w

    params = pltpu.CompilerParams(
        dimension_semantics=("parallel",),
        vmem_limit_bytes=_VMEM_LIMIT_BYTES,
    )

    if c <= _SUBLANE_C_MAX:
        # Channels on the sublane axis, long spatial axis lane-dense.
        # Free reshape (no transpose, no pad): NCHW with n == 1 is (C, H*W).
        x2d = x.reshape(c, hw)
        lt = _choose_lane_tile(c, hw)
        out2d = pl.pallas_call(
            _softmax_sublane_kernel,
            out_shape=jax.ShapeDtypeStruct((c, hw), x.dtype),
            grid=(pl.cdiv(hw, lt),),
            in_specs=[pl.BlockSpec((c, lt), lambda i: (0, i))],
            out_specs=pl.BlockSpec((c, lt), lambda i: (0, i)),
            compiler_params=params,
        )(x2d)
        return out2d.reshape(n, c, h, w)

    # Huge channel count: fall back to lane reduction (one wrapper transpose
    # each way); channels are lane-dense, softmax over the last axis.
    xt = jnp.transpose(x, (0, 2, 3, 1)).reshape(hw, c)
    rt = _choose_row_tile(c, hw)
    out2d = pl.pallas_call(
        _softmax_lastdim_kernel,
        out_shape=jax.ShapeDtypeStruct((hw, c), x.dtype),
        grid=(pl.cdiv(hw, rt),),
        in_specs=[pl.BlockSpec((rt, c), lambda i: (i, 0))],
        out_specs=pl.BlockSpec((rt, c), lambda i: (i, 0)),
        compiler_params=params,
    )(xt)
    return jnp.transpose(out2d.reshape(n, h, w, c), (0, 3, 1, 2))


# ------------------------------- test -------------------------------------- #

if __name__ == "__main__":
    key = jax.random.PRNGKey(0)
    # batch must be 1: the module's keepdim-less broadcast requires it.
    x = jax.random.normal(key, (1, 4, 16, 16), dtype=jnp.float32)

    y = jax.block_until_ready(safe_softmax(x))

    # Pure-JAX reference matching the PyTorch forward (batch == 1).
    ref = jax.nn.softmax(x - jnp.max(x, axis=1, keepdims=True), axis=1)

    assert y.shape == x.shape and y.dtype == x.dtype
    assert jnp.allclose(y, ref, atol=1e-5, rtol=1e-5)
    # Outputs are a valid softmax: channels sum to 1.
    assert jnp.allclose(jnp.sum(y, axis=1), 1.0, atol=1e-5)
    print("KERNEL_OK")
</pallas_src>

<mosaic_0001>
module attributes {stable_mosaic.version = 11 : i64} {
  func.func @_softmax_sublane_kernel(%arg0: i32, %arg1: memref<4x256xf32, #tpu.memory_space<vmem>>, %arg2: memref<4x256xf32, #tpu.memory_space<vmem>>) attributes {dimension_semantics = [#tpu.dimension_semantics<parallel>], iteration_bounds = array<i64: 1>, scalar_prefetch = 0 : i64, scratch_operands = 0 : i64, tpu.core_type = #tpu.core_type<tc>, window_params = [{transform_indices = @transform_0, window_bounds = array<i64: 4, 256>}, {transform_indices = @transform_1, window_bounds = array<i64: 4, 256>}]} {
    %c0 = arith.constant 0 : index
    %c0_0 = arith.constant 0 : index
    %0 = vector.load %arg1[%c0, %c0_0] : memref<4x256xf32, #tpu.memory_space<vmem>>, vector<4x256xf32>
    %cst = arith.constant dense<0xFF800000> : vector<256xf32>
    %1 = vector.multi_reduction <maximumf>, %0, %cst [0] : vector<4x256xf32> to vector<256xf32>
    %2 = vector.shape_cast %1 : vector<256xf32> to vector<1x256xf32>
    %3 = vector.broadcast %2 : vector<1x256xf32> to vector<4x256xf32>
    %4 = arith.subf %0, %3 : vector<4x256xf32>
    %5 = math.exp %4 : vector<4x256xf32>
    %cst_1 = arith.constant dense<0.000000e+00> : vector<256xf32>
    %6 = vector.multi_reduction <add>, %5, %cst_1 [0] : vector<4x256xf32> to vector<256xf32>
    %7 = vector.shape_cast %6 : vector<256xf32> to vector<1x256xf32>
    %8 = vector.broadcast %7 : vector<1x256xf32> to vector<4x256xf32>
    %9 = arith.divf %5, %8 : vector<4x256xf32>
    %c0_2 = arith.constant 0 : index
    %c0_3 = arith.constant 0 : index
    %10 = vector.load %arg2[%c0_2, %c0_3] : memref<4x256xf32, #tpu.memory_space<vmem>>, vector<4x256xf32>
    tpu.vector_store %arg2[%c0_2, %c0_3], %9 {strides = array<i32>} : memref<4x256xf32, #tpu.memory_space<vmem>>, vector<4x256xf32>,
    return
  }
  func.func @transform_0(%arg0: i32) -> (i32, i32) {
    %c0_i32 = arith.constant 0 : i32
    %c0_i32_0 = arith.constant 0 : i32
    return %c0_i32, %arg0 : i32, i32
  }
  func.func @transform_1(%arg0: i32) -> (i32, i32) {
    %c0_i32 = arith.constant 0 : i32
    %c0_i32_0 = arith.constant 0 : i32
    return %c0_i32, %arg0 : i32, i32
  }
}

</mosaic_0001>

<bundles_post_ra>
// kernel: tpu_custom_call.1
= control target key start
LH: loop header
LB: loop body
LE: loop exit
PB: predicated region body
PF: predicated region fallthrough
CT: control target
= control target key end

     0   :  { %6 = vsyncpa [#allocation3], 0  ;;  %s181_s0 = inlined_call_operand.hbm [shape: f32[4,256], index: 0, kind: input, shape index: {}]   ;;  %s182_s1 = inlined_call_operand.hbm [shape: f32[4,256], index: 1, kind: output, shape index: {}]  }
   0x1   :  { %7 = vsyncpa [#allocation4], 0  ;;  %s141_s6 = smov [#allocation2]   ;;  %s93_s10 = scalar_lea.hbm %s181_s0, 128 }
   0x2   :  { %s14_s7 = sshll.u32 %s141_s6, 4  ;;  %p94_p0 = scmp.ne.s32.totalorder %s181_s0, %s93_s10  ;;  %s15_s7 = int_to_ptr.vmem [resolvable:$true] %s14_s7 }
   0x3   :  { %p97_p1 = scmp.lt.u32.totalorder %s93_s10, %s181_s0 }
   0x5   :  { %p99_p2 = pnand %p97_p1, %p94_p0 }
   0x7   :  { %102 = shalt.err (!%p99_p2)
}
   0x8   :  { %s103_s15 = scalar_lea.vmem %s15_s7, 128  ;;  %p108_p4 = scmp.lt.s32.totalorder %s15_s7, %s15_s7 }
   0x9   :  { %p104_p3 = scmp.ne.s32.totalorder %s15_s7, %s103_s15  ;;  %p109_p5 = scmp.lt.s32.totalorder %s103_s15, %s103_s15 }
   0xb   :  { %p110_p6 = por %p109_p5, %p108_p4 }
   0xd   :  { %p111_p7 = pnand %p110_p6, %p104_p3 }
   0xf   :  { %114 = shalt.err (!%p111_p7)
}
  0x10   :  { %17 = dma.hbm_to_vmem [thread:$0]  %s181_s0, 128, %s15_s7, [#allocation3]  }
  0x11   :  { %137 = dma.done.wait [#allocation3], 128  }
  0x12   :  { %138 = vsyncadd [#allocation3], 4294967168  ;;  %vm25_vm0 = vcmask 1043456   ;;  %v21_v0 = vld [vmem:[#allocation2] sm:$0xff]  ;;  %s142_s0 = smov [#allocation5]  }
  0x13   :  { %v23_v1 = vcombine.high %v21_v0, %v21_v0  ;;  %v26_v2 = vsel %vm25_vm0, %v21_v0, -inf  ;;  %s77_s18 = sshll.u32 %s142_s0, 4  ;;  %s78_s18 = int_to_ptr.vmem [resolvable:$true] %s77_s18 }
  0x14   :  { %v27_v3 = vrot.slane %v26_v2, 4  ;;  %s115_s19 = scalar_lea.vmem %s78_s18, 128  ;;  %p120_p9 = scmp.lt.s32.totalorder %s78_s18, %s78_s18 }
  0x15   :  { %v33_v4 = vsel %vm25_vm0, %v23_v1, -inf  ;;  %p116_p8 = scmp.ne.s32.totalorder %s78_s18, %s115_s19  ;;  %p121_p10 = scmp.lt.s32.totalorder %s115_s19, %s115_s19 }
  0x16   :  { %v28_v5 = vmax.f32 %v26_v2, %v27_v3  ;;  %v34_v6 = vrot.slane %v33_v4, 4 }
  0x17   :  { %p122_p11 = por %p121_p10, %p120_p9 }
  0x18   :  { %v29_v7 = vrot.slane %v28_v5, 2  ;;  %v35_v8 = vmax.f32 %v33_v4, %v34_v6 }
  0x19   :  { %p123_p12 = pnand %p122_p11, %p116_p8 }
  0x1a   :  { %v30_v9 = vmax.f32 %v28_v5, %v29_v7  ;;  %v36_v10 = vrot.slane %v35_v8, 2 }
  0x1c   :  { %v31_v11 = vrot.slane %v30_v9, 1  ;;  %v37_v12 = vmax.f32 %v35_v8, %v36_v10 }
  0x1e   :  { %v32_v13 = vmax.f32 %v30_v9, %v31_v11  ;;  %v38_v14 = vrot.slane %v37_v12, 1 }
  0x20   :  { %v39_v15 = vmax.f32 %v37_v12, %v38_v14 }
  0x22   :  { %v42_v16 = vcombine.low %v32_v13, %v39_v15 }
  0x24   :  { %v44_v17 = vsub.f32 %v21_v0, %v42_v16 }
  0x26   :  { %v45_v18 = vmul.f32 1.442695, %v44_v17 }
  0x28   :  { %89 = vpow2.f32 %v45_v18 }
  0x32   :  { %v90_v19 = vpop.eup %89 }
  0x33   :  { %v48_v20 = vcombine.high %v90_v19, %v90_v19  ;;  %v50_v21 = vsel %vm25_vm0, %v90_v19, 0.0 }
  0x34   :  { %v51_v22 = vrot.slane %v50_v21, 4 }
  0x35   :  { %v57_v23 = vsel %vm25_vm0, %v48_v20, 0.0 }
  0x36   :  { %v52_v24 = vadd.f32 %v51_v22, %v50_v21  ;;  %v58_v25 = vrot.slane %v57_v23, 4 }
  0x38   :  { %v53_v26 = vrot.slane %v52_v24, 2  ;;  %v59_v27 = vadd.f32 %v58_v25, %v57_v23 }
  0x3a   :  { %v54_v28 = vadd.f32 %v53_v26, %v52_v24  ;;  %v60_v29 = vrot.slane %v59_v27, 2 }
  0x3c   :  { %v55_v30 = vrot.slane %v54_v28, 1  ;;  %v61_v31 = vadd.f32 %v60_v29, %v59_v27 }
  0x3e   :  { %v56_v32 = vadd.f32 %v55_v30, %v54_v28  ;;  %v62_v33 = vrot.slane %v61_v31, 1 }
  0x40   :  { %v63_v34 = vadd.f32 %v62_v33, %v61_v31 }
  0x42   :  { %v66_v35 = vcombine.low %v56_v32, %v63_v34 }
  0x44   :  { %91 = vrcp.f32 %v66_v35 }
  0x4e   :  { %v92_v36 = vpop.eup %91 }
  0x4f   :  { %v69_v37 = vmul.f32 %v92_v36, %v90_v19 }
  0x51   :  { %70 = vst [vmem:[#allocation5] sm:$0xff] %v69_v37 }
  0x52   :  { %126 = shalt.err (!%p123_p12)
}
  0x53   :  { %s127_s22 = scalar_lea.hbm %s182_s1, 128 }
  0x54   :  { %p128_p13 = scmp.ne.s32.totalorder %s182_s1, %s127_s22  ;;  %p131_p0 = scmp.lt.u32.totalorder %s127_s22, %s182_s1 }
  0x56   :  { %p133_p1 = pnand %p131_p0, %p128_p13 }
  0x58   :  { %136 = shalt.err (!%p133_p1)
}
  0x59   :  { %80 = dma.vmem_to_hbm [thread:$0]  %s78_s18, 128, %s182_s1, [#allocation4]  }
  0x5a   :  { %139 = dma.done.wait [#allocation4], 128  }
  0x5b   :  { %140 = vsyncadd [#allocation4], 4294967168 }
  0x5c   :  { %84 = vsyncpa [#allocation3], 1 }
  0x5d   :  { %85 = vsyncpa [#allocation4], 1 }

</bundles_post_ra>
